<compile_context>
chip_gen: v7x
topology: tpu7x:2x2x1
jax: 0.10.0
libtpu: 0.0.40
codegen_flags: <defaults>
</compile_context>

<pallas_src>
import jax
import jax.numpy as jnp
from jax import lax
from jax.experimental import pallas as pl
from jax.experimental.pallas import tpu as pltpu

EPS = 1e-5


def _make_kernel(H, KH, mxu_dtype):
    """Fused residual-block kernel.

    In-kernel layout (prepared by the wrapper):
      x_ref  : (M, L) f32, M = N*H rows, lane index = w*Cpad + c (L % 128 == 0).
      w*_ref : (KH*L, L) banded conv weights (one matmul per conv), mxu_dtype.
      g_ref  : (L, L) f32 same-channel averaging matrix (folds 1/(N*H*W)).
      aff_ref: (8, L) f32 per-lane rows [g1, be1, g2, be2, 0, 0, 0, 0].
      out_ref: (M, L) f32.
    """
    ph = KH // 2

    def kernel(x_ref, w1_ref, w2_ref, g_ref, aff_ref, out_ref):
        M, L = x_ref.shape
        x = x_ref[...]                                     # f32; also the residual

        # Hoisted boundary masks shared by both convs: rows whose source
        # height h + d falls outside [0, H) are zeroed.  Kept (M, 1) and
        # broadcast inside jnp.where.
        h_idx = lax.broadcasted_iota(jnp.int32, (M, 1), 0) % H
        masks = {}
        for kh in range(KH):
            d = kh - ph
            if d != 0:
                masks[d] = (h_idx >= -d) & (h_idx < H - d)

        def height_patches(a):
            # im2col over the KH height taps -> (M, KH*L).  Tap kh reads row
            # h + (kh - ph): a sublane roll (XLU) + boundary mask.  Roll/mask
            # stay in f32 (v5e has no bf16 VPU); one cast at the end feeds
            # the MXU.
            blocks = []
            for kh in range(KH):
                d = kh - ph
                if d == 0:
                    blk = a
                else:
                    rolled = pltpu.roll(a, shift=(-d) % M, axis=0)
                    blk = jnp.where(masks[d], rolled, 0.0)
                blocks.append(blk)
            return jnp.concatenate(blocks, axis=1).astype(mxu_dtype)

        def batchnorm(acc, gamma_l, beta_l):
            # Training-mode BN, biased variance.  Reduce over rows first
            # (XLU), then one tiny (1, L) x (L, L) grouping matmul per stat
            # which sums the W lanes of each channel, folds 1/(N*H*W) and
            # re-broadcasts the per-channel stat to all of its lanes.
            s1 = jnp.sum(acc, axis=0, keepdims=True)                    # (1, L)
            s2 = jnp.sum(acc * acc, axis=0, keepdims=True)              # (1, L)
            mean = jnp.dot(s1, g_ref[...], preferred_element_type=jnp.float32)
            ex2 = jnp.dot(s2, g_ref[...], preferred_element_type=jnp.float32)
            var = jnp.maximum(ex2 - mean * mean, 0.0)   # guard one-pass cancellation
            scale = gamma_l * lax.rsqrt(var + EPS)                      # (1, L)
            shift = beta_l - mean * scale                               # (1, L)
            return acc * scale + shift

        g1, be1 = aff_ref[0:1, :], aff_ref[1:2, :]
        g2, be2 = aff_ref[2:3, :], aff_ref[3:4, :]

        # ---- conv1 (single MXU matmul, f32 accumulation) -> bn1 -> relu ----
        # Conv bias is dropped: with training-mode BN right after, it is
        # absorbed by the mean and has zero effect (exact simplification).
        acc1 = jnp.dot(height_patches(x), w1_ref[...],
                       preferred_element_type=jnp.float32)
        y1 = jnp.maximum(batchnorm(acc1, g1, be1), 0.0)

        # ---- conv2 -> bn2 -> +residual -> relu ----
        acc2 = jnp.dot(height_patches(y1), w2_ref[...],
                       preferred_element_type=jnp.float32)
        y2 = batchnorm(acc2, g2, be2)
        out_ref[...] = jnp.maximum(y2 + x, 0.0)          # full-width lane-dense store

    return kernel


def make_residual_block(params, *, N, H, W, mxu_dtype=jnp.bfloat16):
    """Build a jitted forward(x_nchw) with all constant preprocessing hoisted.

    The banded conv weights, BN grouping matrix and per-lane affine rows are
    computed ONCE here (and the conv weights pre-cast to the MXU dtype); the
    per-call jitted path only does the x layout + pallas_call.
    """
    w1, w2 = params["w1"], params["w2"]
    KH, KW, Cin, Cout = w1.shape
    assert Cin == Cout, "residual add requires in_channels == out_channels"
    assert KW % 2 == 1, "odd t_kernel_s required so width is preserved"
    pw = KW // 2

    # Lane-dense channel padding: minor dim of every kernel tensor is W*Cpad,
    # a multiple of 128 (Cpad = 8 for W = 16, C = 4).
    Cpad = Cout
    while (W * Cpad) % 128 != 0:
        Cpad += 1
    L = W * Cpad
    M = N * H

    # ---- banded (Toeplitz-over-width) conv weights: each conv == one matmul.
    #      A_kh[w_in*Cpad+ci, w_out*Cpad+co] = w[kh, w_in-w_out+pw, ci, co]
    #      (zeros outside the band reproduce the width zero-padding).
    def band_weight(w_hwio):
        kw = jnp.arange(W)[:, None] - jnp.arange(W)[None, :] + pw       # (W_in, W_out)
        valid = (kw >= 0) & (kw < KW)
        kw_c = jnp.clip(kw, 0, KW - 1)
        blocks = []
        for kh in range(KH):
            blk = jnp.where(valid[:, :, None, None], w_hwio[kh][kw_c], 0.0)  # (W,W,Ci,Co)
            blk = jnp.pad(blk, ((0, 0), (0, 0), (0, Cpad - Cin), (0, Cpad - Cout)))
            blocks.append(jnp.transpose(blk, (0, 2, 1, 3)).reshape(L, L))
        return jnp.concatenate(blocks, axis=0).astype(mxu_dtype)        # (KH*L, L)

    w1_big = band_weight(w1.astype(jnp.float32))
    w2_big = band_weight(w2.astype(jnp.float32))

    # Same-channel averaging matrix for BN statistics (folds 1/(N*H*W)).
    lane_c = jnp.arange(L) % Cpad
    g_mat = (lane_c[:, None] == lane_c[None, :]).astype(jnp.float32) / (N * H * W)

    # Per-lane BN affine params (padded channels zeroed): g1, be1, g2, be2.
    def lane_vec(v):
        vv = jnp.zeros((Cpad,), jnp.float32).at[:v.shape[0]].set(v.astype(jnp.float32))
        return jnp.tile(vv, W)

    aff = jnp.stack([lane_vec(params[k]) for k in ("g1", "be1", "g2", "be2")]
                    + [jnp.zeros((L,), jnp.float32)] * 4)                # (8, L)

    itemsize = jnp.dtype(mxu_dtype).itemsize
    cost = pl.CostEstimate(
        flops=2 * 2 * M * (KH * L) * L + 4 * 2 * L * L,
        transcendentals=2 * L,
        bytes_accessed=(4 * (2 * M * L + L * L + 8 * L)
                        + itemsize * 2 * KH * L * L))

    # Scoped VMEM sized from the actual live set (x, out, banded weights,
    # g_mat, aff, im2col/accumulator temporaries) with 2x slack -- well under
    # v7x's 64 MiB physical VMEM instead of a blanket 32 MiB.
    footprint = (4 * (2 * M * L + L * L + 8 * L)          # f32 x, out, g_mat, aff
                 + itemsize * 2 * KH * L * L               # banded weights
                 + itemsize * 2 * M * KH * L               # im2col patches
                 + 4 * 4 * M * L)                          # f32 acc/temporaries
    vmem_limit = int(max(2 * footprint, 2 * 1024 * 1024))

    vmem = pl.BlockSpec(memory_space=pltpu.MemorySpace.VMEM)
    # BN couples the whole (N, H, W) batch and the working set is < 1 MiB, so
    # a single fully VMEM-resident invocation (no grid) is used.
    # TODO(synk): for large N*H*W (or to use both v7x TensorCores) switch to a
    # two-phase gridded variant (per-tile partial stats -> combine ->
    # normalize) with the M axis marked "parallel" in dimension_semantics.
    kernel_call = pl.pallas_call(
        _make_kernel(H, KH, mxu_dtype),
        out_shape=jax.ShapeDtypeStruct((M, L), jnp.float32),
        in_specs=[vmem] * 5,
        out_specs=vmem,
        compiler_params=pltpu.CompilerParams(vmem_limit_bytes=vmem_limit),
        cost_estimate=cost,
    )

    @jax.jit
    def forward(x_nchw):
        assert x_nchw.shape == (N, Cin, H, W), "shape fixed at factory time"
        # Layout plumbing only: NCHW -> (N*H, W*Cpad), lane index = w*Cpad + c.
        x = jnp.transpose(x_nchw, (0, 2, 3, 1)).astype(jnp.float32)      # NHWC
        x = jnp.pad(x, ((0, 0), (0, 0), (0, 0), (0, Cpad - Cin)))
        x_rows = x.reshape(M, L)
        out_rows = kernel_call(x_rows, w1_big, w2_big, g_mat, aff)
        out = out_rows.reshape(N, H, W, Cpad)[..., :Cout]
        return jnp.transpose(out, (0, 3, 1, 2))                          # NCHW

    return forward


def init_params(key, in_channels, out_channels, t_kernel_s):
    """Mirror the PyTorch module's __init__ (shapes + init distributions).

    Conv weights (stored HWIO = (KH, KW, Cin, Cout)): kaiming-normal,
    mode='fan_out' => std = sqrt(2 / (Cout*KH*KW)).
    Conv biases: U(-1/sqrt(fan_in), 1/sqrt(fan_in)) (PyTorch default).
    bn1: weight=1, bias=0.  bn2: weight=0, bias=0.
    """
    KH, KW = 3, t_kernel_s
    k1, k2, k3, k4 = jax.random.split(key, 4)
    std = (2.0 / (out_channels * KH * KW)) ** 0.5
    w1 = jax.random.normal(k1, (KH, KW, in_channels, out_channels), jnp.float32) * std
    w2 = jax.random.normal(k2, (KH, KW, out_channels, out_channels), jnp.float32) * std
    bnd1 = 1.0 / (in_channels * KH * KW) ** 0.5
    bnd2 = 1.0 / (out_channels * KH * KW) ** 0.5
    return {
        "w1": w1,
        "b1": jax.random.uniform(k3, (out_channels,), jnp.float32, -bnd1, bnd1),
        "g1": jnp.ones((out_channels,), jnp.float32),
        "be1": jnp.zeros((out_channels,), jnp.float32),
        "w2": w2,
        "b2": jax.random.uniform(k4, (out_channels,), jnp.float32, -bnd2, bnd2),
        "g2": jnp.zeros((out_channels,), jnp.float32),
        "be2": jnp.zeros((out_channels,), jnp.float32),
    }


def ref_forward(x_nchw, params, conv_dtype=jnp.float32):
    """Pure-JAX reference with identical semantics (matching conv-operand dtype).

    Includes the conv biases; the kernel drops them because training-mode BN
    absorbs a per-channel bias exactly.
    """
    KH, KW = params["w1"].shape[:2]
    ph, pw = KH // 2, KW // 2

    def conv(x, w_hwio, b):
        y = lax.conv_general_dilated(
            x.astype(conv_dtype),
            jnp.transpose(w_hwio, (3, 2, 0, 1)).astype(conv_dtype),   # OIHW
            (1, 1), ((ph, ph), (pw, pw)),
            dimension_numbers=("NCHW", "OIHW", "NCHW"),
            precision=lax.Precision.HIGHEST,
            preferred_element_type=jnp.float32)
        return y + b.reshape(1, -1, 1, 1)

    def bn(x, g, be):
        mean = jnp.mean(x, axis=(0, 2, 3), keepdims=True)
        var = jnp.mean((x - mean) ** 2, axis=(0, 2, 3), keepdims=True)
        return (g.reshape(1, -1, 1, 1) * (x - mean) * lax.rsqrt(var + EPS)
                + be.reshape(1, -1, 1, 1))

    y = jnp.maximum(bn(conv(x_nchw, params["w1"], params["b1"]),
                       params["g1"], params["be1"]), 0.0)
    y = bn(conv(y, params["w2"], params["b2"]), params["g2"], params["be2"])
    return jnp.maximum(y + x_nchw, 0.0)


if __name__ == "__main__":
    key = jax.random.PRNGKey(0)
    kp, kx, kg, kb = jax.random.split(key, 4)

    in_channels = out_channels = 4   # residual add requires in == out
    t_kernel_s = 3                   # odd kernel width preserves W
    N, H, W = 2, 16, 16

    params = init_params(kp, in_channels, out_channels, t_kernel_s)
    # The module inits bn2.weight to 0, which makes the conv2/bn2 path
    # numerically invisible; use nonzero bn2 affine params in the self-check
    # so that path is actually exercised.
    params["g2"] = jax.random.uniform(kg, (out_channels,), jnp.float32, 0.5, 1.5)
    params["be2"] = jax.random.uniform(kb, (out_channels,), jnp.float32, -0.5, 0.5)

    x = jax.random.normal(kx, (N, in_channels, H, W), jnp.float32)

    # Default path: bf16 MXU operands (all generations), f32 accumulation and
    # f32 elementwise.  Compare against a reference with the same operand cast.
    fwd_bf16 = make_residual_block(params, N=N, H=H, W=W, mxu_dtype=jnp.bfloat16)
    out_bf16 = jax.block_until_ready(fwd_bf16(x))
    ref_bf16 = ref_forward(x, params, conv_dtype=jnp.bfloat16)
    assert out_bf16.shape == (N, out_channels, H, W)
    err_bf16 = float(jnp.max(jnp.abs(out_bf16 - ref_bf16)))
    assert err_bf16 < 2e-2, f"bf16 path mismatch: max abs err = {err_bf16}"

    # f32 MXU-operand path vs the f32 reference (tight tolerance).
    fwd_f32 = make_residual_block(params, N=N, H=H, W=W, mxu_dtype=jnp.float32)
    out_f32 = jax.block_until_ready(fwd_f32(x))
    ref_f32 = ref_forward(x, params, conv_dtype=jnp.float32)
    err_f32 = float(jnp.max(jnp.abs(out_f32 - ref_f32)))
    assert err_f32 < 1e-3, f"f32 path mismatch: max abs err = {err_f32}"

    print("KERNEL_OK")
</pallas_src>

<mosaic_0001>
module attributes {stable_mosaic.version = 11 : i64} {
  func.func @kernel(%arg0: memref<32x128xf32, #tpu.memory_space<vmem>>, %arg1: memref<384x128xbf16, #tpu.memory_space<vmem>>, %arg2: memref<384x128xbf16, #tpu.memory_space<vmem>>, %arg3: memref<128x128xf32, #tpu.memory_space<vmem>>, %arg4: memref<8x128xf32, #tpu.memory_space<vmem>>, %arg5: memref<32x128xf32, #tpu.memory_space<vmem>>) attributes {dimension_semantics = [], scalar_prefetch = 0 : i64, scratch_operands = 0 : i64, tpu.core_type = #tpu.core_type<tc>} {
    %c0 = arith.constant 0 : index
    %c0_0 = arith.constant 0 : index
    %0 = vector.load %arg0[%c0, %c0_0] : memref<32x128xf32, #tpu.memory_space<vmem>>, vector<32x128xf32>
    %1 = tpu.iota {dimensions = array<i32: 0>} : vector<32x1xi32>
    %c16_i32 = arith.constant 16 : i32
    %c0_i32 = arith.constant 0 : i32
    %2 = arith.cmpi eq, %c16_i32, %c0_i32 : i32
    %c1_i32 = arith.constant 1 : i32
    %3 = arith.select %2, %c1_i32, %c16_i32 : i32
    %4 = vector.broadcast %3 : i32 to vector<32x1xi32>
    %5 = arith.remsi %1, %4 : vector<32x1xi32>
    %c0_i32_1 = arith.constant 0 : i32
    %6 = vector.broadcast %c0_i32_1 : i32 to vector<32x1xi32>
    %7 = arith.cmpi ne, %5, %6 : vector<32x1xi32>
    %c0_i32_2 = arith.constant 0 : i32
    %8 = vector.broadcast %c0_i32_2 : i32 to vector<32x1xi32>
    %9 = arith.cmpi slt, %5, %8 : vector<32x1xi32>
    %c0_i32_3 = arith.constant 0 : i32
    %10 = arith.cmpi slt, %3, %c0_i32_3 : i32
    %11 = vector.broadcast %10 : i1 to vector<32x1xi1>
    %12 = vector.broadcast %11 : vector<32x1xi1> to vector<32x1xi1>
    %13 = arith.xori %9, %12 : vector<32x1xi1>
    %14 = arith.andi %13, %7 : vector<32x1xi1>
    %15 = vector.broadcast %3 : i32 to vector<32x1xi32>
    %16 = arith.addi %5, %15 : vector<32x1xi32>
    %17 = arith.select %14, %16, %5 : vector<32x1xi1>, vector<32x1xi32>
    %c1_i32_4 = arith.constant 1 : i32
    %18 = vector.broadcast %c1_i32_4 : i32 to vector<32x1xi32>
    %19 = arith.cmpi sge, %17, %18 : vector<32x1xi32>
    %c17_i32 = arith.constant 17 : i32
    %20 = vector.broadcast %c17_i32 : i32 to vector<32x1xi32>
    %21 = arith.cmpi slt, %17, %20 : vector<32x1xi32>
    %22 = arith.andi %19, %21 : vector<32x1xi1>
    %c-1_i32 = arith.constant -1 : i32
    %23 = vector.broadcast %c-1_i32 : i32 to vector<32x1xi32>
    %24 = arith.cmpi sge, %17, %23 : vector<32x1xi32>
    %c15_i32 = arith.constant 15 : i32
    %25 = vector.broadcast %c15_i32 : i32 to vector<32x1xi32>
    %26 = arith.cmpi slt, %17, %25 : vector<32x1xi32>
    %27 = arith.andi %24, %26 : vector<32x1xi1>
    %c0_5 = arith.constant 0 : index
    %c0_6 = arith.constant 0 : index
    %28 = vector.load %arg4[%c0_5, %c0_6] : memref<8x128xf32, #tpu.memory_space<vmem>>, vector<1x128xf32>
    %c1 = arith.constant 1 : index
    %c0_7 = arith.constant 0 : index
    %29 = vector.load %arg4[%c1, %c0_7] : memref<8x128xf32, #tpu.memory_space<vmem>>, vector<1x128xf32>
    %c2 = arith.constant 2 : index
    %c0_8 = arith.constant 0 : index
    %30 = vector.load %arg4[%c2, %c0_8] : memref<8x128xf32, #tpu.memory_space<vmem>>, vector<1x128xf32>
    %c3 = arith.constant 3 : index
    %c0_9 = arith.constant 0 : index
    %31 = vector.load %arg4[%c3, %c0_9] : memref<8x128xf32, #tpu.memory_space<vmem>>, vector<1x128xf32>
    %c1_i32_10 = arith.constant 1 : i32
    %32 = tpu.dynamic_rotate %0 by %c1_i32_10 dim 0 : vector<32x128xf32>, i32 -> vector<32x128xf32>
    %cst = arith.constant 0.000000e+00 : f32
    %33 = vector.shape_cast %22 : vector<32x1xi1> to vector<32x1xi1>
    %34 = vector.broadcast %33 : vector<32x1xi1> to vector<32x128xi1>
    %35 = vector.broadcast %cst : f32 to vector<32x128xf32>
    %36 = arith.select %34, %32, %35 : vector<32x128xi1>, vector<32x128xf32>
    %c31_i32 = arith.constant 31 : i32
    %37 = tpu.dynamic_rotate %0 by %c31_i32 dim 0 : vector<32x128xf32>, i32 -> vector<32x128xf32>
    %cst_11 = arith.constant 0.000000e+00 : f32
    %38 = vector.shape_cast %27 : vector<32x1xi1> to vector<32x1xi1>
    %39 = vector.broadcast %38 : vector<32x1xi1> to vector<32x128xi1>
    %40 = vector.broadcast %cst_11 : f32 to vector<32x128xf32>
    %41 = arith.select %39, %37, %40 : vector<32x128xi1>, vector<32x128xf32>
    %42 = tpu.concatenate %36, %0, %41 in 1 : vector<32x128xf32>, vector<32x128xf32>, vector<32x128xf32> -> vector<32x384xf32>
    %43 = arith.truncf %42 : vector<32x384xf32> to vector<32x384xbf16>
    %c0_12 = arith.constant 0 : index
    %c0_13 = arith.constant 0 : index
    %44 = vector.load %arg1[%c0_12, %c0_13] : memref<384x128xbf16, #tpu.memory_space<vmem>>, vector<384x128xbf16>
    %cst_14 = arith.constant dense<0.000000e+00> : vector<32x128xf32>
    %45 = tpu.matmul %43, %44, %cst_14 {dimension_numbers = #tpu.dot_dimension_numbers<[1], [0], [0], [1], [0, 0, 1, 1], [], []>} : vector<32x384xbf16>, vector<384x128xbf16>, vector<32x128xf32> -> vector<32x128xf32>
    %cst_15 = arith.constant dense<0.000000e+00> : vector<128xf32>
    %46 = vector.multi_reduction <add>, %45, %cst_15 [0] : vector<32x128xf32> to vector<128xf32>
    %47 = vector.shape_cast %46 : vector<128xf32> to vector<1x128xf32>
    %48 = arith.mulf %45, %45 : vector<32x128xf32>
    %cst_16 = arith.constant dense<0.000000e+00> : vector<128xf32>
    %49 = vector.multi_reduction <add>, %48, %cst_16 [0] : vector<32x128xf32> to vector<128xf32>
    %50 = vector.shape_cast %49 : vector<128xf32> to vector<1x128xf32>
    %c0_17 = arith.constant 0 : index
    %c0_18 = arith.constant 0 : index
    %51 = vector.load %arg3[%c0_17, %c0_18] : memref<128x128xf32, #tpu.memory_space<vmem>>, vector<128x128xf32>
    %cst_19 = arith.constant dense<0.000000e+00> : vector<1x128xf32>
    %52 = tpu.matmul %47, %51, %cst_19 {dimension_numbers = #tpu.dot_dimension_numbers<[1], [0], [0], [1], [0, 0, 1, 1], [], []>} : vector<1x128xf32>, vector<128x128xf32>, vector<1x128xf32> -> vector<1x128xf32>
    %c0_20 = arith.constant 0 : index
    %c0_21 = arith.constant 0 : index
    %53 = vector.load %arg3[%c0_20, %c0_21] : memref<128x128xf32, #tpu.memory_space<vmem>>, vector<128x128xf32>
    %cst_22 = arith.constant dense<0.000000e+00> : vector<1x128xf32>
    %54 = tpu.matmul %50, %53, %cst_22 {dimension_numbers = #tpu.dot_dimension_numbers<[1], [0], [0], [1], [0, 0, 1, 1], [], []>} : vector<1x128xf32>, vector<128x128xf32>, vector<1x128xf32> -> vector<1x128xf32>
    %55 = arith.mulf %52, %52 : vector<1x128xf32>
    %56 = arith.subf %54, %55 : vector<1x128xf32>
    %cst_23 = arith.constant 0.000000e+00 : f32
    %57 = vector.broadcast %cst_23 : f32 to vector<1x128xf32>
    %58 = arith.maximumf %56, %57 : vector<1x128xf32>
    %cst_24 = arith.constant 9.99999974E-6 : f32
    %59 = vector.broadcast %cst_24 : f32 to vector<1x128xf32>
    %60 = arith.addf %58, %59 : vector<1x128xf32>
    %61 = math.rsqrt %60 : vector<1x128xf32>
    %62 = arith.mulf %28, %61 : vector<1x128xf32>
    %63 = arith.mulf %52, %62 : vector<1x128xf32>
    %64 = arith.subf %29, %63 : vector<1x128xf32>
    %65 = vector.broadcast %62 : vector<1x128xf32> to vector<32x128xf32>
    %66 = arith.mulf %45, %65 : vector<32x128xf32>
    %67 = vector.broadcast %64 : vector<1x128xf32> to vector<32x128xf32>
    %68 = arith.addf %66, %67 : vector<32x128xf32>
    %cst_25 = arith.constant 0.000000e+00 : f32
    %69 = vector.broadcast %cst_25 : f32 to vector<32x128xf32>
    %70 = arith.maximumf %68, %69 : vector<32x128xf32>
    %c1_i32_26 = arith.constant 1 : i32
    %71 = tpu.dynamic_rotate %70 by %c1_i32_26 dim 0 : vector<32x128xf32>, i32 -> vector<32x128xf32>
    %cst_27 = arith.constant 0.000000e+00 : f32
    %72 = vector.shape_cast %22 : vector<32x1xi1> to vector<32x1xi1>
    %73 = vector.broadcast %72 : vector<32x1xi1> to vector<32x128xi1>
    %74 = vector.broadcast %cst_27 : f32 to vector<32x128xf32>
    %75 = arith.select %73, %71, %74 : vector<32x128xi1>, vector<32x128xf32>
    %c31_i32_28 = arith.constant 31 : i32
    %76 = tpu.dynamic_rotate %70 by %c31_i32_28 dim 0 : vector<32x128xf32>, i32 -> vector<32x128xf32>
    %cst_29 = arith.constant 0.000000e+00 : f32
    %77 = vector.shape_cast %27 : vector<32x1xi1> to vector<32x1xi1>
    %78 = vector.broadcast %77 : vector<32x1xi1> to vector<32x128xi1>
    %79 = vector.broadcast %cst_29 : f32 to vector<32x128xf32>
    %80 = arith.select %78, %76, %79 : vector<32x128xi1>, vector<32x128xf32>
    %81 = tpu.concatenate %75, %70, %80 in 1 : vector<32x128xf32>, vector<32x128xf32>, vector<32x128xf32> -> vector<32x384xf32>
    %82 = arith.truncf %81 : vector<32x384xf32> to vector<32x384xbf16>
    %c0_30 = arith.constant 0 : index
    %c0_31 = arith.constant 0 : index
    %83 = vector.load %arg2[%c0_30, %c0_31] : memref<384x128xbf16, #tpu.memory_space<vmem>>, vector<384x128xbf16>
    %cst_32 = arith.constant dense<0.000000e+00> : vector<32x128xf32>
    %84 = tpu.matmul %82, %83, %cst_32 {dimension_numbers = #tpu.dot_dimension_numbers<[1], [0], [0], [1], [0, 0, 1, 1], [], []>} : vector<32x384xbf16>, vector<384x128xbf16>, vector<32x128xf32> -> vector<32x128xf32>
    %cst_33 = arith.constant dense<0.000000e+00> : vector<128xf32>
    %85 = vector.multi_reduction <add>, %84, %cst_33 [0] : vector<32x128xf32> to vector<128xf32>
    %86 = vector.shape_cast %85 : vector<128xf32> to vector<1x128xf32>
    %87 = arith.mulf %84, %84 : vector<32x128xf32>
    %cst_34 = arith.constant dense<0.000000e+00> : vector<128xf32>
    %88 = vector.multi_reduction <add>, %87, %cst_34 [0] : vector<32x128xf32> to vector<128xf32>
    %89 = vector.shape_cast %88 : vector<128xf32> to vector<1x128xf32>
    %c0_35 = arith.constant 0 : index
    %c0_36 = arith.constant 0 : index
    %90 = vector.load %arg3[%c0_35, %c0_36] : memref<128x128xf32, #tpu.memory_space<vmem>>, vector<128x128xf32>
    %cst_37 = arith.constant dense<0.000000e+00> : vector<1x128xf32>
    %91 = tpu.matmul %86, %90, %cst_37 {dimension_numbers = #tpu.dot_dimension_numbers<[1], [0], [0], [1], [0, 0, 1, 1], [], []>} : vector<1x128xf32>, vector<128x128xf32>, vector<1x128xf32> -> vector<1x128xf32>
    %c0_38 = arith.constant 0 : index
    %c0_39 = arith.constant 0 : index
    %92 = vector.load %arg3[%c0_38, %c0_39] : memref<128x128xf32, #tpu.memory_space<vmem>>, vector<128x128xf32>
    %cst_40 = arith.constant dense<0.000000e+00> : vector<1x128xf32>
    %93 = tpu.matmul %89, %92, %cst_40 {dimension_numbers = #tpu.dot_dimension_numbers<[1], [0], [0], [1], [0, 0, 1, 1], [], []>} : vector<1x128xf32>, vector<128x128xf32>, vector<1x128xf32> -> vector<1x128xf32>
    %94 = arith.mulf %91, %91 : vector<1x128xf32>
    %95 = arith.subf %93, %94 : vector<1x128xf32>
    %cst_41 = arith.constant 0.000000e+00 : f32
    %96 = vector.broadcast %cst_41 : f32 to vector<1x128xf32>
    %97 = arith.maximumf %95, %96 : vector<1x128xf32>
    %cst_42 = arith.constant 9.99999974E-6 : f32
    %98 = vector.broadcast %cst_42 : f32 to vector<1x128xf32>
    %99 = arith.addf %97, %98 : vector<1x128xf32>
    %100 = math.rsqrt %99 : vector<1x128xf32>
    %101 = arith.mulf %30, %100 : vector<1x128xf32>
    %102 = arith.mulf %91, %101 : vector<1x128xf32>
    %103 = arith.subf %31, %102 : vector<1x128xf32>
    %104 = vector.broadcast %101 : vector<1x128xf32> to vector<32x128xf32>
    %105 = arith.mulf %84, %104 : vector<32x128xf32>
    %106 = vector.broadcast %103 : vector<1x128xf32> to vector<32x128xf32>
    %107 = arith.addf %105, %106 : vector<32x128xf32>
    %108 = arith.addf %107, %0 : vector<32x128xf32>
    %cst_43 = arith.constant 0.000000e+00 : f32
    %109 = vector.broadcast %cst_43 : f32 to vector<32x128xf32>
    %110 = arith.maximumf %108, %109 : vector<32x128xf32>
    %c0_44 = arith.constant 0 : index
    %c0_45 = arith.constant 0 : index
    %111 = vector.load %arg5[%c0_44, %c0_45] : memref<32x128xf32, #tpu.memory_space<vmem>>, vector<32x128xf32>
    tpu.vector_store %arg5[%c0_44, %c0_45], %110 {strides = array<i32>} : memref<32x128xf32, #tpu.memory_space<vmem>>, vector<32x128xf32>,
    return
  }
}

</mosaic_0001>

<bundles_post_ra>
// kernel: forward.1
= control target key start
LH: loop header
LB: loop body
LE: loop exit
PB: predicated region body
PF: predicated region fallthrough
CT: control target
= control target key end

     0   :  { %v25_v8 = vlaneseq  ;;  %vm1720_vm4 = vmmov 1   ;;  %v1721_v63 = vmov 0.0|0.0   ;;  %vm1722_vm11 = vmmov 0   ;;  %s2213_s1 = inlined_call_operand.vmem [shape: bf16[384,128], index: 1, kind: input, shape index: {}]   ;;  %s2214_s0 = inlined_call_operand.vmem [shape: f32[32,128], index: 0, kind: input, shape index: {}]   ;;  %s2215_s3 = inlined_call_operand.vmem [shape: f32[128,128], index: 3, kind: input, shape index: {}]   ;;  %s2216_s2 = inlined_call_operand.vmem [shape: bf16[384,128], index: 2, kind: input, shape index: {}]   ;;  %s2217_s4 = inlined_call_operand.vmem [shape: f32[8,128], index: 4, kind: input, shape index: {}]   ;;  %s2218_s5 = inlined_call_operand.vmem [shape: f32[32,128], index: 5, kind: output, shape index: {}]  }
   0x1   :  { %v1668_v0 = vld [vmem:[%s2213_s1 + $0x40] sm:$0xff]   ;;  %v1671_v3 = vld [vmem:[%s2213_s1 + $0x48] sm:$0xff]   ;;  %v1674_v6 = vld [vmem:[%s2213_s1 + $0x50] sm:$0xff]  }
   0x2   :  { %v1669_v1 = vld [vmem:[%s2213_s1] sm:$0xff]   ;;  %1244 = vmatprep.subr.bf16.mxu0 %v1668_v0  ;;  %v1672_v4 = vld [vmem:[%s2213_s1 + $0x8] sm:$0xff]   ;;  %v1675_v7 = vld [vmem:[%s2213_s1 + $0x10] sm:$0xff]   ;;  %v1790_v13 = vshrl.u32 %v25_v8, 7 }
   0x3   :  { %v1670_v2 = vld [vmem:[%s2213_s1 + $0x80] sm:$0xff]   ;;  %1245 = vmatpush3.bf16.msra.mxu0 %v1669_v1  ;;  %v1673_v5 = vld [vmem:[%s2213_s1 + $0x88] sm:$0xff]   ;;  %v1676_v9 = vld [vmem:[%s2213_s1 + $0x90] sm:$0xff]  }
   0x4   :  { %1388 = vmatprep.subr.bf16.mxu1 %v1670_v2  ;;  %1246 = vmatprep.subr.bf16.mxu0 %v1671_v3  ;;  %v1677_v10 = vld [vmem:[%s2213_s1 + $0x58] sm:$0xff]   ;;  %v1680_v14 = vld [vmem:[%s2213_s1 + $0x60] sm:$0xff]   ;;  %v27_v17 = vadd.s32 8, %v1790_v13  ;;  %v1683_v18 = vld [vmem:[%s2213_s1 + $0x68] sm:$0xff]   ;;  %v29_v23 = vadd.s32 24, %v1790_v13  ;;  %v34_v26 = vand.u32 15, %v1790_v13 }
   0x5   :  { %1389 = vmatpush3.bf16.msra.mxu1 %v1670_v2  ;;  %v1678_v11 = vld [vmem:[%s2213_s1 + $0x18] sm:$0xff]   ;;  %v1682_v15 = vld [vmem:[%s2213_s1 + $0xa0] sm:$0xff]   ;;  %v1685_v19 = vld [vmem:[%s2213_s1 + $0xa8] sm:$0xff]   ;;  %vm110_vm0 = vcmp.lt.s32.totalorder %v1790_v13, 1  ;;  %vm131_vm2 = vcmp.lt.s32.totalorder %v1790_v13, 7  ;;  %v28_v50 = vadd.s32 16, %v1790_v13 }
   0x6   :  { %1390 = vmatprep.subr.bf16.mxu1 %v1673_v5  ;;  %v1679_v12 = vld [vmem:[%s2213_s1 + $0x98] sm:$0xff]   ;;  %v1681_v16 = vld [vmem:[%s2213_s1 + $0x20] sm:$0xff]   ;;  %v1684_v20 = vld [vmem:[%s2213_s1 + $0x28] sm:$0xff]   ;;  %v41_v21 = vand.u32 15, %v27_v17  ;;  %v55_v32 = vand.u32 15, %v29_v23  ;;  %vm1870_vm3 = vcmp.ge.s32.totalorder %v34_v26, 1 }
   0x7   :  { %1247 = vmatpush3.bf16.msra.mxu0 %v1672_v4  ;;  %v1686_v22 = vld [vmem:[%s2213_s1 + $0x70] sm:$0xff]   ;;  %v1689_v27 = vld [vmem:[%s2213_s1 + $0x78] sm:$0xff]   ;;  %v1829_v28 = vld [vmem:[%s2214_s0] sm:$0xff]  ;;  %v48_v62 = vand.u32 15, %v28_v50 }
   0x8   :  { %1248 = vmatprep.subr.bf16.mxu0 %v1674_v6  ;;  %v1687_v24 = vld [vmem:[%s2213_s1 + $0x30] sm:$0xff]   ;;  %v1834_v29 = vld [vmem:[%s2214_s0 + $0x8] sm:$0xff]  ;;  %v1839_v30 = vld [vmem:[%s2214_s0 + $0x18] sm:$0xff]  ;;  %vm1841_vm1 = vcmp.lt.s32.totalorder %v41_v21, 15  ;;  %v106_v33 = vrot.slane %v1829_v28, 7  ;;  %v127_v39 = vrot.slane %v1829_v28, 1 }
   0x9   :  { %1391 = vmatpush3.bf16.msra.mxu1 %v1673_v5  ;;  %v1688_v25 = vld [vmem:[%s2213_s1 + $0xb0] sm:$0xff]   ;;  %v107_v34 = vrot.slane %v1834_v29, 7  ;;  %v149_v35 = vpack.c.bf16 %v1834_v29, %v1829_v28  ;;  %v109_v36 = vrot.slane %v1839_v30, 7  ;;  %v1691_v38 = vld [vmem:[%s2213_s1 + $0xb8] sm:$0xff]   ;;  %v128_v40 = vrot.slane %v1834_v29, 1  ;;  %vm1881_vm5 = vmpackc.low %vm1841_vm1, %vm1720_vm4 }
   0xa   :  { %1392 = vmatprep.subr.bf16.mxu1 %v1676_v9  ;;  %v1854_v37 = vld [vmem:[%s2214_s0 + $0x10] sm:$0xff]  ;;  %v130_v42 = vrot.slane %v1839_v30, 1  ;;  %v1690_v43 = vld [vmem:[%s2213_s1 + $0x38] sm:$0xff]   ;;  %v466_v51 = vld [vmem:[%s2215_s3] sm:$0xff]  ;;  %vm97_vm6 = vcmp.lt.s32.totalorder %v55_v32, 15  ;;  %vm80_vm9 = vcmp.ge.s32.totalorder %v48_v62, 1 }
   0xb   :  { %1249 = vmatpush3.bf16.msra.mxu0 %v1675_v7  ;;  %v129_v41 = vrot.slane %v1854_v37, 1  ;;  %378 = vmatprep.mubr.bf16.mxu0 %v149_v35  ;;  %v113_v44 = vsel %vm110_vm0, %v106_v33, %v107_v34  ;;  %v114_v45 = vsel %vm110_vm0, %v109_v36, %v106_v33  ;;  %v134_v48 = vsel %vm131_vm2, %v127_v39, %v128_v40  ;;  %v467_v52 = vld [vmem:[%s2215_s3 + $0x8] sm:$0xff]  ;;  %vm1899_vm7 = vmpackc.low %vm1720_vm4, %vm1870_vm3  ;;  %v468_v5 = vld [vmem:[%s2215_s3 + $0x10] sm:$0xff] }
   0xc   :  { %1250 = vmatprep.subr.bf16.mxu0 %v1677_v10  ;;  %v135_v55 = vsel %vm131_vm2, %v130_v42, %v127_v39  ;;  %v1197_v56 = vpack.c.bf16 %v113_v44, %v114_v45  ;;  %v152_v58 = vpack.c.bf16 %v1839_v30, %v1854_v37  ;;  %v108_v59 = vrot.slane %v1854_v37, 7  ;;  %vm1912_vm8 = vmpackc.low %vm97_vm6, %vm1720_vm4  ;;  %v469_v6 = vld [vmem:[%s2215_s3 + $0x18] sm:$0xff]  ;;  %v470_v8 = vld [vmem:[%s2215_s3 + $0x20] sm:$0xff] }
   0xd   :  { %1393 = vmatpush3.bf16.msra.mxu1 %v1676_v9  ;;  %v133_v47 = vsel %vm131_vm2, %v128_v40, %v129_v41  ;;  %v132_v54 = vsel %vm131_vm2, %v129_v41, %v130_v42  ;;  %v1908_v60 = vpack.c.bf16 %v467_v52, %v466_v51  ;;  %vm1930_vm10 = vmpackc.low %vm1720_vm4, %vm80_vm9  ;;  %v1942_v7 = vpack.c.bf16 %v469_v6, %v468_v5  ;;  %v471_v9 = vld [vmem:[%s2215_s3 + $0x28] sm:$0xff]  ;;  %v478_v21 = vld [vmem:[%s2215_s3 + $0x60] sm:$0xff] }
   0xe   :  { %1394 = vmatprep.subr.bf16.mxu1 %v1679_v12  ;;  %v1203_v53 = vpack.c.bf16 %v133_v47, %v134_v48  ;;  %v1206_v61 = vpack.c.bf16 %v135_v55, %v132_v54  ;;  %v111_v1 = vsel %vm110_vm0, %v108_v59, %v109_v36  ;;  %v112_v2 = vsel %vm110_vm0, %v107_v34, %v108_v59 }
   0xf   :  { %1251 = vmatpush3.bf16.msra.mxu0 %v1678_v11  ;;  %v1200_v3 = vpack.c.bf16 %v111_v1, %v112_v2  ;;  %v1954_v10 = vpack.c.bf16 %v471_v9, %v470_v8  ;;  %v472_v11 = vld [vmem:[%s2215_s3 + $0x30] sm:$0xff] }
  0x10   :  { %1252 = vmatprep.subr.bf16.mxu0 %v1680_v14  ;;  %1404 = vmatprep.mubr.msk.bf16.mxu1 %vm1881_vm5, %v1203_v53 }
  0x11   :  { %1395 = vmatpush3.bf16.msra.mxu1 %v1679_v12  ;;  %v473_v12 = vld [vmem:[%s2215_s3 + $0x38] sm:$0xff] }
  0x12   :  { %1396 = vmatprep.subr.bf16.mxu1 %v1682_v15  ;;  %v1966_v14 = vpack.c.bf16 %v473_v12, %v472_v11 }
  0x13   :  { %1253 = vmatpush3.bf16.msra.mxu0 %v1681_v16  ;;  %v475_v16 = vld [vmem:[%s2215_s3 + $0x48] sm:$0xff] }
  0x14   :  { %1254 = vmatprep.subr.bf16.mxu0 %v1683_v18  ;;  %v476_v18 = vld [vmem:[%s2215_s3 + $0x50] sm:$0xff] }
  0x15   :  { %1397 = vmatpush3.bf16.msra.mxu1 %v1682_v15  ;;  %v474_v15 = vld [vmem:[%s2215_s3 + $0x40] sm:$0xff] }
  0x16   :  { %1398 = vmatprep.subr.bf16.mxu1 %v1685_v19  ;;  %v1978_v17 = vpack.c.bf16 %v475_v16, %v474_v15 }
  0x17   :  { %1255 = vmatpush3.bf16.msra.mxu0 %v1684_v20 }
  0x18   :  { %1256 = vmatprep.subr.bf16.mxu0 %v1686_v22  ;;  %v479_v22 = vld [vmem:[%s2215_s3 + $0x68] sm:$0xff] }
  0x19   :  { %1399 = vmatpush3.bf16.msra.mxu1 %v1685_v19  ;;  %v477_v19 = vld [vmem:[%s2215_s3 + $0x58] sm:$0xff]  ;;  %v2002_v23 = vpack.c.bf16 %v479_v22, %v478_v21  ;;  %v1692_v22 = vld [vmem:[%s2216_s2 + $0x40] sm:$0xff]  }
  0x1a   :  { %1400 = vmatprep.subr.bf16.mxu1 %v1688_v25  ;;  %v1990_v20 = vpack.c.bf16 %v477_v19, %v476_v18 }
  0x1b   :  { %1257 = vmatpush3.bf16.msra.mxu0 %v1687_v24  ;;  %v480_v24 = vld [vmem:[%s2215_s3 + $0x70] sm:$0xff] }
  0x1c   :  { %1258 = vmatprep.subr.bf16.mxu0 %v1689_v27  ;;  %v1723_v27 = vmov 0.0  }
  0x1d   :  { %1401 = vmatpush3.bf16.msra.mxu1 %v1688_v25  ;;  %v481_v25 = vld [vmem:[%s2215_s3 + $0x78] sm:$0xff] }
  0x1e   :  { %1402 = vmatprep.subr.bf16.mxu1 %v1691_v38  ;;  %v2014_v26 = vpack.c.bf16 %v481_v25, %v480_v24  ;;  %v1693_v24 = vld [vmem:[%s2216_s2] sm:$0xff]  }
  0x1f   :  { %1259 = vmatpush3.bf16.msra.mxu0 %v1690_v43  ;;  %v1694_v25 = vld [vmem:[%s2216_s2 + $0x80] sm:$0xff]  }
  0x20   :  { %1568 = vmatprep.subr.bf16.mxu0 %v1721_v63 }
  0x21   :  { %1403 = vmatpush3.bf16.msra.mxu1 %v1691_v38 }
  0x22   :  { %1198 = vmatmul.mubr.msk.bf16.vlgmr.msra.gmra.mrb[0].mxu0 %vm1899_vm7, %v1197_v56  ;;  %1592 = vmatprep.subr.bf16.mxu1 %v1721_v63 }
  0x23   :  { %386 = vmatprep.mubr.bf16.mxu0 %v152_v58  ;;  %1570 = vmatpush3.bf16.msra.mxu0 %v1908_v60 }
  0x24   :  { %1405 = vmatmul.mubr.msk.bf16.vlgmr.msra.gmra.mrb[0].mxu1 %vm1912_vm8, %v1206_v61  ;;  %1571 = vmatprep.subr.bf16.mxu0 %v1721_v63 }
  0x25   :  { %1594 = vmatpush3.bf16.msra.mxu1 %v1908_v60  ;;  %1475 = vmatprep.mubr.msk.f32.mxu1 %vm1722_vm11, %v1723_v27 }
  0x26   :  { %1595 = vmatprep.subr.bf16.mxu1 %v1721_v63 }
  0x27   :  { %1573 = vmatpush3.bf16.msra.mxu0 %v1942_v7 }
  0x28   :  { %1574 = vmatprep.subr.bf16.mxu0 %v1721_v63 }
  0x29   :  { %1597 = vmatpush3.bf16.msra.mxu1 %v1942_v7 }
  0x2a   :  { %1201 = vmatmul.mubr.msk.bf16.gmra.mrb[4].mxu0 %vm1930_vm10, %v1200_v3  ;;  %1598 = vmatprep.subr.bf16.mxu1 %v1721_v63 }
  0x2b   :  { %1576 = vmatpush3.bf16.msra.mxu0 %v1954_v10  ;;  %1440 = vmatprep.mubr.msk.f32.mxu0 %vm1722_vm11, %v1723_v27 }
  0x2c   :  { %1577 = vmatprep.subr.bf16.mxu0 %v1721_v63 }
  0x2d   :  { %1600 = vmatpush3.bf16.msra.mxu1 %v1954_v10 }
  0x2e   :  { %1601 = vmatprep.subr.bf16.mxu1 %v1721_v63 }
  0x2f   :  { %1579 = vmatpush3.bf16.msra.mxu0 %v1966_v14 }
  0x30   :  { %1580 = vmatprep.subr.bf16.mxu0 %v1721_v63 }
  0x31   :  { %1603 = vmatpush3.bf16.msra.mxu1 %v1966_v14 }
  0x32   :  { %1604 = vmatprep.subr.bf16.mxu1 %v1721_v63 }
  0x33   :  { %1582 = vmatpush3.bf16.msra.mxu0 %v1978_v17 }
  0x34   :  { %1583 = vmatprep.subr.bf16.mxu0 %v1721_v63 }
  0x35   :  { %1606 = vmatpush3.bf16.msra.mxu1 %v1978_v17 }
  0x36   :  { %1607 = vmatprep.subr.bf16.mxu1 %v1721_v63 }
  0x37   :  { %1585 = vmatpush3.bf16.msra.mxu0 %v1990_v20 }
  0x38   :  { %1586 = vmatprep.subr.bf16.mxu0 %v1721_v63 }
  0x39   :  { %1609 = vmatpush3.bf16.msra.mxu1 %v1990_v20 }
  0x3a   :  { %1610 = vmatprep.subr.bf16.mxu1 %v1721_v63 }
  0x3b   :  { %1588 = vmatpush3.bf16.msra.mxu0 %v2002_v23 }
  0x3c   :  { %1589 = vmatprep.subr.bf16.mxu0 %v1721_v63 }
  0x3d   :  { %1612 = vmatpush3.bf16.msra.mxu1 %v2002_v23 }
  0x3e   :  { %1613 = vmatprep.subr.bf16.mxu1 %v1721_v63 }
  0x3f   :  { %1591 = vmatpush3.bf16.msra.mxu0 %v2014_v26 }
  0x40   :  { %1316 = vmatprep.subr.bf16.mxu0 %v1692_v22 }
  0x41   :  { %1615 = vmatpush3.bf16.msra.mxu1 %v2014_v26 }
  0x42   :  { %1478 = vmatprep.subr.bf16.mxu1 %v1694_v25 }
  0xf5   :  { %v1260_v31 = vpop.f32.mrb[0].mxu0 }
  0xf6   :  { %v1261_v32 = vpop.f32.mrb[1].mxu0 }
  0xf7   :  { %v1262_v33 = vadd.f32 %v1261_v32, %v1260_v31  ;;  %v1263_v34 = vpop.f32.mrb[2].mxu0  ;;  %v1406_v35 = vpop.f32.mrb[0].mxu1  ;;  %v1695_v31 = vld [vmem:[%s2216_s2 + $0x48] sm:$0xff]  }
  0xf8   :  { %v1264_v36 = vpop.f32.mrb[3].mxu0  ;;  %v429_v38 = vpop.f32.mrb[1].mxu1  ;;  %v1696_v32 = vld [vmem:[%s2216_s2 + $0x8] sm:$0xff]  }
  0xf9   :  { %v1265_v39 = vadd.f32 %v1264_v36, %v1263_v34  ;;  %v2022_v40 = vadd.f32 %v1262_v33, %v429_v38  ;;  %v1407_v41 = vpop.f32.mrb[2].mxu1  ;;  %v1697_v33 = vld [vmem:[%s2216_s2 + $0x88] sm:$0xff]   ;;  %v1698_v34 = vld [vmem:[%s2216_s2 + $0x50] sm:$0xff]   ;;  %v1701_v38 = vld [vmem:[%s2216_s2 + $0x58] sm:$0xff]  }
  0xfa   :  { %v432_v42 = vpop.f32.mrb[3].mxu1  ;;  %v1700_v36 = vld [vmem:[%s2216_s2 + $0x90] sm:$0xff]  }
  0xfb   :  { %v2024_v43 = vadd.f32 %v1265_v39, %v432_v42  ;;  %v453_v51 = vmul.f32 %v2022_v40, %v2022_v40  ;;  %v1702_v39 = vld [vmem:[%s2216_s2 + $0x18] sm:$0xff]   ;;  %v1704_v42 = vld [vmem:[%s2216_s2 + $0x60] sm:$0xff]  }
  0xfd   :  { %v1266_v44 = vpop.f32.mrb[4].mxu0  ;;  %v454_v46 = vmul.f32 %v2024_v43, %v2024_v43  ;;  %v444_v52 = vadd.f32 %v2024_v43, %v2022_v40 }
  0xfe   :  { %v1267_v45 = vpop.f32.mrb[5].mxu0 }
  0xff   :  { %v1268_v47 = vadd.f32 %v1267_v45, %v1266_v44  ;;  %v1269_v48 = vpop.f32.mrb[6].mxu0  ;;  %v457_v55 = vadd.f32 %v454_v46, %v453_v51  ;;  %v1705_v44 = vld [vmem:[%s2216_s2 + $0x20] sm:$0xff]   ;;  %v1707_v46 = vld [vmem:[%s2216_s2 + $0x68] sm:$0xff]   ;;  %v1712_v51 = vld [vmem:[%s2216_s2 + $0xb0] sm:$0xff]  }
 0x100   :  { %v1270_v50 = vpop.f32.mrb[7].mxu0  ;;  %v1706_v45 = vld [vmem:[%s2216_s2 + $0xa0] sm:$0xff]  }
 0x101   :  { %v2032_v53 = vadd.f32 %v1406_v35, %v1268_v47  ;;  %v1271_v54 = vadd.f32 %v1270_v50, %v1269_v48  ;;  %v1699_v35 = vld [vmem:[%s2216_s2 + $0x10] sm:$0xff]   ;;  %v1708_v47 = vld [vmem:[%s2216_s2 + $0x28] sm:$0xff]  }
 0x102   :  { %v1709_v48 = vld [vmem:[%s2216_s2 + $0xa8] sm:$0xff]   ;;  %v1710_v50 = vld [vmem:[%s2216_s2 + $0x70] sm:$0xff]  }
 0x103   :  { %v445_v56 = vadd.f32 %v444_v52, %v2032_v53  ;;  %v455_v58 = vmul.f32 %v2032_v53, %v2032_v53  ;;  %v2037_v59 = vadd.f32 %v1407_v41, %v1271_v54  ;;  %v1703_v41 = vld [vmem:[%s2216_s2 + $0x98] sm:$0xff]   ;;  %v1711_v52 = vld [vmem:[%s2216_s2 + $0x30] sm:$0xff]  }
 0x104   :  { %v1713_v54 = vld [vmem:[%s2216_s2 + $0x78] sm:$0xff]  }
 0x105   :  { %v458_v61 = vadd.f32 %v457_v55, %v455_v58  ;;  %v446_v62 = vadd.f32 %v445_v56, %v2037_v59  ;;  %v456_v1 = vmul.f32 %v2037_v59, %v2037_v59  ;;  %v1714_v55 = vld [vmem:[%s2216_s2 + $0x38] sm:$0xff]  }
 0x106   :  { %v1715_v56 = vld [vmem:[%s2216_s2 + $0xb8] sm:$0xff]  }
 0x107   :  { %v447_v2 = vrot.slane %v446_v62, 4  ;;  %v459_v3 = vadd.f32 %v458_v61, %v456_v1 }
 0x109   :  { %v448_v5 = vadd.f32 %v447_v2, %v446_v62  ;;  %v460_v6 = vrot.slane %v459_v3, 4 }
 0x10b   :  { %v449_v8 = vrot.slane %v448_v5, 2  ;;  %v461_v9 = vadd.f32 %v460_v6, %v459_v3 }
 0x10d   :  { %v450_v11 = vadd.f32 %v449_v8, %v448_v5  ;;  %v462_v12 = vrot.slane %v461_v9, 2  ;;  %v102_v8 = vld [vmem:[%s2217_s4] sm:$0x1] }
 0x10f   :  { %v451_v15 = vrot.slane %v450_v11, 1  ;;  %v463_v16 = vadd.f32 %v462_v12, %v461_v9  ;;  %v2120_v9 = vsub.s32 0, %v1790_v13 }
 0x111   :  { %v452_v18 = vadd.f32 %v451_v15, %v450_v11  ;;  %v464_v19 = vrot.slane %v463_v16, 1  ;;  %v103_v15 = vld [vmem:[%s2217_s4 + $0x1] sm:$0x1] }
 0x113   :  { %1441 = vmatmul.mubr.f32.vlgmr.msra.gmra.mrb[8].mxu0 %v452_v18  ;;  %v465_v21 = vadd.f32 %v464_v19, %v463_v16 }
 0x114   :  { %1317 = vmatpush3.bf16.msra.mxu0 %v1693_v24 }
 0x115   :  { %1476 = vmatmul.mubr.f32.vlgmr.msra.gmra.mrb[4].mxu1 %v465_v21  ;;  %1318 = vmatprep.subr.bf16.mxu0 %v1695_v31 }
 0x116   :  { %1479 = vmatpush3.bf16.msra.mxu1 %v1694_v25 }
 0x117   :  { %1480 = vmatprep.subr.bf16.mxu1 %v1697_v33 }
 0x118   :  { %1319 = vmatpush3.bf16.msra.mxu0 %v1696_v32 }
 0x119   :  { %1320 = vmatprep.subr.bf16.mxu0 %v1698_v34 }
 0x11a   :  { %1481 = vmatpush3.bf16.msra.mxu1 %v1697_v33 }
 0x11b   :  { %1482 = vmatprep.subr.bf16.mxu1 %v1700_v36 }
 0x11c   :  { %1321 = vmatpush3.bf16.msra.mxu0 %v1699_v35 }
 0x11d   :  { %1322 = vmatprep.subr.bf16.mxu0 %v1701_v38 }
 0x11e   :  { %1483 = vmatpush3.bf16.msra.mxu1 %v1700_v36 }
 0x11f   :  { %1484 = vmatprep.subr.bf16.mxu1 %v1703_v41 }
 0x120   :  { %1323 = vmatpush3.bf16.msra.mxu0 %v1702_v39 }
 0x121   :  { %1324 = vmatprep.subr.bf16.mxu0 %v1704_v42 }
 0x122   :  { %1485 = vmatpush3.bf16.msra.mxu1 %v1703_v41 }
 0x123   :  { %1486 = vmatprep.subr.bf16.mxu1 %v1706_v45 }
 0x124   :  { %1325 = vmatpush3.bf16.msra.mxu0 %v1705_v44 }
 0x125   :  { %1326 = vmatprep.subr.bf16.mxu0 %v1707_v46 }
 0x126   :  { %1487 = vmatpush3.bf16.msra.mxu1 %v1706_v45 }
 0x127   :  { %1488 = vmatprep.subr.bf16.mxu1 %v1709_v48 }
 0x128   :  { %1327 = vmatpush3.bf16.msra.mxu0 %v1708_v47 }
 0x129   :  { %1328 = vmatprep.subr.bf16.mxu0 %v1710_v50 }
 0x12a   :  { %1489 = vmatpush3.bf16.msra.mxu1 %v1709_v48 }
 0x12b   :  { %1490 = vmatprep.subr.bf16.mxu1 %v1712_v51 }
 0x12c   :  { %1329 = vmatpush3.bf16.msra.mxu0 %v1711_v52 }
 0x12d   :  { %1330 = vmatprep.subr.bf16.mxu0 %v1713_v54 }
 0x12e   :  { %1491 = vmatpush3.bf16.msra.mxu1 %v1712_v51 }
 0x12f   :  { %1492 = vmatprep.subr.bf16.mxu1 %v1715_v56 }
 0x130   :  { %1331 = vmatpush3.bf16.msra.mxu0 %v1714_v55 }
 0x131   :  { %1616 = vmatprep.subr.bf16.mxu0 %v1721_v63 }
 0x132   :  { %1493 = vmatpush3.bf16.msra.mxu1 %v1715_v56 }
 0x133   :  { %1640 = vmatprep.subr.bf16.mxu1 %v1721_v63 }
 0x1e6   :  { %v548_v58 = vpop.f32.mrb[8].mxu0 }
 0x1e7   :  { %v622_v61 = vmul.f32 %v548_v58, %v548_v58  ;;  %v1442_v62 = vpop.f32.mrb[9].mxu0 }
 0x1e8   :  { %v618_v1 = vpop.f32.mrb[4].mxu1 }
 0x1e9   :  { %v623_v2 = vsub.f32 %v618_v1, %v622_v61  ;;  %v1477_v3 = vpop.f32.mrb[5].mxu1 }
 0x1eb   :  { %v624_v5 = vmax.f32 %v623_v2, 0.0 }
 0x1ed   :  { %v625_v6 = vadd.f32 1e-05, %v624_v5 }
 0x1ef   :  { %1716 = vrsqrt.f32 %v625_v6 }
 0x1f9   :  { %v1717_v11 = vpop.eup %1716 }
 0x1fa   :  { %v627_v12 = vmul.f32 %v1717_v11, %v102_v8 }
 0x1fc   :  { %v628_v16 = vmul.f32 %v627_v12, %v548_v58  ;;  %v633_v18 = vrot.slane %v627_v12, %v2120_v9 }
 0x1fe   :  { %v629_v19 = vsub.f32 %v103_v15, %v628_v16  ;;  %v637_v21 = vmul.f32 %v633_v18, %v2037_v59  ;;  %v634_v22 = vmul.f32 %v633_v18, %v2022_v40  ;;  %v635_v24 = vmul.f32 %v633_v18, %v2024_v43 }
 0x1ff   :  { %v636_v31 = vmul.f32 %v633_v18, %v2032_v53 }
 0x200   :  { %v641_v25 = vrot.slane %v629_v19, %v2120_v9 }
 0x202   :  { %v642_v32 = vadd.f32 %v641_v25, %v634_v22  ;;  %v643_v33 = vadd.f32 %v641_v25, %v635_v24  ;;  %v645_v34 = vadd.f32 %v641_v25, %v637_v21  ;;  %v644_v35 = vadd.f32 %v641_v25, %v636_v31 }
 0x204   :  { %v646_v36 = vmax.f32 %v642_v32, 0.0  ;;  %v647_v38 = vmax.f32 %v643_v33, 0.0  ;;  %v649_v39 = vmax.f32 %v645_v34, 0.0  ;;  %v648_v41 = vmax.f32 %v644_v35, 0.0 }
 0x206   :  { %v650_v42 = vrot.slane %v646_v36, 7  ;;  %v651_v44 = vrot.slane %v647_v38, 7  ;;  %v675_v45 = vpack.c.bf16 %v647_v38, %v646_v36  ;;  %v653_v59 = vrot.slane %v649_v39, 7 }
 0x207   :  { %v662_v46 = vrot.slane %v646_v36, 1  ;;  %v663_v40 = vrot.slane %v647_v38, 1  ;;  %v664_v47 = vrot.slane %v648_v41, 1  ;;  %v678_v43 = vpack.c.bf16 %v649_v39, %v648_v41 }
 0x208   :  { %904 = vmatprep.mubr.bf16.mxu0 %v675_v45  ;;  %v656_v53 = vsel %vm110_vm0, %v650_v42, %v651_v44  ;;  %v657_v48 = vsel %vm110_vm0, %v653_v59, %v650_v42  ;;  %v665_v50 = vrot.slane %v649_v39, 1  ;;  %v652_v51 = vrot.slane %v648_v41, 7 }
 0x209   :  { %v1233_v52 = vpack.c.bf16 %v656_v53, %v657_v48  ;;  %v667_v54 = vsel %vm131_vm2, %v663_v40, %v664_v47  ;;  %v668_v55 = vsel %vm131_vm2, %v662_v46, %v663_v40 }
 0x20a   :  { %v1239_v56 = vpack.c.bf16 %v667_v54, %v668_v55  ;;  %v666_v58 = vsel %vm131_vm2, %v664_v47, %v665_v50  ;;  %v669_v61 = vsel %vm131_vm2, %v665_v50, %v662_v46  ;;  %v654_v62 = vsel %vm110_vm0, %v652_v51, %v653_v59  ;;  %v104_v54 = vld [vmem:[%s2217_s4 + $0x2] sm:$0x1] }
 0x20b   :  { %1234 = vmatmul.mubr.msk.bf16.vlgmr.msra.gmra.mrb[12].mxu0 %vm1899_vm7, %v1233_v52  ;;  %v1242_v1 = vpack.c.bf16 %v669_v61, %v666_v58  ;;  %v655_v2 = vsel %vm110_vm0, %v651_v44, %v652_v51  ;;  %v105_v58 = vld [vmem:[%s2217_s4 + $0x3] sm:$0x1] }
 0x20c   :  { %1494 = vmatprep.mubr.msk.bf16.mxu1 %vm1881_vm5, %v1239_v56  ;;  %912 = vmatprep.mubr.bf16.mxu0 %v678_v43  ;;  %v1236_v3 = vpack.c.bf16 %v654_v62, %v655_v2 }
 0x20d   :  { %1495 = vmatmul.mubr.msk.bf16.vlgmr.msra.gmra.mrb[8].mxu1 %vm1912_vm8, %v1242_v1  ;;  %1618 = vmatpush3.bf16.msra.mxu0 %v1908_v60 }
 0x20e   :  { %1642 = vmatpush3.bf16.msra.mxu1 %v1908_v60  ;;  %1619 = vmatprep.subr.bf16.mxu0 %v1721_v63 }
 0x20f   :  { %1643 = vmatprep.subr.bf16.mxu1 %v1721_v63  ;;  %1565 = vmatprep.mubr.msk.f32.mxu1 %vm1722_vm11, %v1723_v27 }
 0x211   :  { %1621 = vmatpush3.bf16.msra.mxu0 %v1942_v7 }
 0x212   :  { %1645 = vmatpush3.bf16.msra.mxu1 %v1942_v7  ;;  %1622 = vmatprep.subr.bf16.mxu0 %v1721_v63 }
 0x213   :  { %1237 = vmatmul.mubr.msk.bf16.gmra.mrb[16].mxu0 %vm1930_vm10, %v1236_v3  ;;  %1646 = vmatprep.subr.bf16.mxu1 %v1721_v63 }
 0x214   :  { %1530 = vmatprep.mubr.msk.f32.mxu0 %vm1722_vm11, %v1723_v27 }
 0x215   :  { %1624 = vmatpush3.bf16.msra.mxu0 %v1954_v10 }
 0x216   :  { %1648 = vmatpush3.bf16.msra.mxu1 %v1954_v10  ;;  %1625 = vmatprep.subr.bf16.mxu0 %v1721_v63 }
 0x217   :  { %1649 = vmatprep.subr.bf16.mxu1 %v1721_v63 }
 0x219   :  { %1627 = vmatpush3.bf16.msra.mxu0 %v1966_v14 }
 0x21a   :  { %1651 = vmatpush3.bf16.msra.mxu1 %v1966_v14  ;;  %1628 = vmatprep.subr.bf16.mxu0 %v1721_v63 }
 0x21b   :  { %1652 = vmatprep.subr.bf16.mxu1 %v1721_v63 }
 0x21d   :  { %1630 = vmatpush3.bf16.msra.mxu0 %v1978_v17 }
 0x21e   :  { %1654 = vmatpush3.bf16.msra.mxu1 %v1978_v17  ;;  %1631 = vmatprep.subr.bf16.mxu0 %v1721_v63 }
 0x21f   :  { %1655 = vmatprep.subr.bf16.mxu1 %v1721_v63 }
 0x221   :  { %1633 = vmatpush3.bf16.msra.mxu0 %v1990_v20 }
 0x222   :  { %1657 = vmatpush3.bf16.msra.mxu1 %v1990_v20  ;;  %1634 = vmatprep.subr.bf16.mxu0 %v1721_v63 }
 0x223   :  { %1658 = vmatprep.subr.bf16.mxu1 %v1721_v63 }
 0x225   :  { %1636 = vmatpush3.bf16.msra.mxu0 %v2002_v23 }
 0x226   :  { %1660 = vmatpush3.bf16.msra.mxu1 %v2002_v23  ;;  %1637 = vmatprep.subr.bf16.mxu0 %v1721_v63 }
 0x227   :  { %1661 = vmatprep.subr.bf16.mxu1 %v1721_v63 }
 0x229   :  { %1639 = vmatpush3.bf16.msra.mxu0 %v2014_v26 }
 0x22a   :  { %1663 = vmatpush3.bf16.msra.mxu1 %v2014_v26 }
 0x2de   :  { %v1332_v13 = vpop.f32.mrb[12].mxu0 }
 0x2df   :  { %v1333_v49 = vpop.f32.mrb[13].mxu0 }
 0x2e0   :  { %v1334_v57 = vadd.f32 %v1333_v49, %v1332_v13  ;;  %v1496_v60 = vpop.f32.mrb[8].mxu1  ;;  %v1335_v0 = vpop.f32.mrb[14].mxu0 }
 0x2e1   :  { %v955_v4 = vpop.f32.mrb[9].mxu1  ;;  %v1336_v7 = vpop.f32.mrb[15].mxu0 }
 0x2e2   :  { %v956_v10 = vadd.f32 %v1334_v57, %v955_v4  ;;  %v1337_v14 = vadd.f32 %v1336_v7, %v1335_v0  ;;  %v1497_v17 = vpop.f32.mrb[10].mxu1 }
 0x2e3   :  { %v958_v20 = vpop.f32.mrb[11].mxu1 }
 0x2e4   :  { %v959_v23 = vadd.f32 %v1337_v14, %v958_v20  ;;  %v979_v12 = vmul.f32 %v956_v10, %v956_v10 }
 0x2e6   :  { %v1338_v27 = vpop.f32.mrb[16].mxu0  ;;  %v980_v6 = vmul.f32 %v959_v23, %v959_v23  ;;  %v970_v26 = vadd.f32 %v959_v23, %v956_v10 }
 0x2e7   :  { %v1339_v5 = vpop.f32.mrb[17].mxu0 }
 0x2e8   :  { %v1340_v63 = vadd.f32 %v1339_v5, %v1338_v27  ;;  %v1341_v8 = vpop.f32.mrb[18].mxu0  ;;  %v983_v18 = vadd.f32 %v980_v6, %v979_v12 }
 0x2e9   :  { %v1342_v11 = vpop.f32.mrb[19].mxu0 }
 0x2ea   :  { %v964_v15 = vadd.f32 %v1496_v60, %v1340_v63  ;;  %v1343_v16 = vadd.f32 %v1342_v11, %v1341_v8 }
 0x2ec   :  { %v971_v19 = vadd.f32 %v970_v26, %v964_v15  ;;  %v981_v21 = vmul.f32 %v964_v15, %v964_v15  ;;  %v967_v22 = vadd.f32 %v1497_v17, %v1343_v16 }
 0x2ee   :  { %v984_v24 = vadd.f32 %v983_v18, %v981_v21  ;;  %v972_v25 = vadd.f32 %v971_v19, %v967_v22  ;;  %v982_v31 = vmul.f32 %v967_v22, %v967_v22 }
 0x2f0   :  { %v973_v32 = vrot.slane %v972_v25, 4  ;;  %v985_v33 = vadd.f32 %v984_v24, %v982_v31 }
 0x2f2   :  { %v974_v34 = vadd.f32 %v973_v32, %v972_v25  ;;  %v986_v35 = vrot.slane %v985_v33, 4 }
 0x2f4   :  { %v975_v36 = vrot.slane %v974_v34, 2  ;;  %v987_v38 = vadd.f32 %v986_v35, %v985_v33 }
 0x2f6   :  { %v976_v39 = vadd.f32 %v975_v36, %v974_v34  ;;  %v988_v41 = vrot.slane %v987_v38, 2 }
 0x2f8   :  { %v977_v42 = vrot.slane %v976_v39, 1  ;;  %v989_v44 = vadd.f32 %v988_v41, %v987_v38 }
 0x2fa   :  { %v978_v45 = vadd.f32 %v977_v42, %v976_v39  ;;  %v990_v59 = vrot.slane %v989_v44, 1 }
 0x2fc   :  { %1531 = vmatmul.mubr.f32.vlgmr.msra.gmra.mrb[10].mxu0 %v978_v45  ;;  %v991_v46 = vadd.f32 %v990_v59, %v989_v44 }
 0x2fe   :  { %1566 = vmatmul.mubr.f32.vlgmr.msra.gmra.mrb[6].mxu1 %v991_v46 }
 0x3cf   :  { %v1058_v40 = vpop.f32.mrb[10].mxu0 }
 0x3d0   :  { %v1132_v47 = vmul.f32 %v1058_v40, %v1058_v40  ;;  %v1532_v43 = vpop.f32.mrb[11].mxu0 }
 0x3d1   :  { %v1128_v53 = vpop.f32.mrb[6].mxu1 }
 0x3d2   :  { %v1133_v48 = vsub.f32 %v1128_v53, %v1132_v47  ;;  %v1567_v50 = vpop.f32.mrb[7].mxu1 }
 0x3d4   :  { %v1134_v51 = vmax.f32 %v1133_v48, 0.0 }
 0x3d6   :  { %v1135_v52 = vadd.f32 1e-05, %v1134_v51 }
 0x3d8   :  { %1718 = vrsqrt.f32 %v1135_v52 }
 0x3e2   :  { %v1719_v55 = vpop.eup %1718 }
 0x3e3   :  { %v1137_v56 = vmul.f32 %v1719_v55, %v104_v54 }
 0x3e5   :  { %v1138_v61 = vmul.f32 %v1137_v56, %v1058_v40  ;;  %v1143_v62 = vrot.slane %v1137_v56, %v2120_v9 }
 0x3e7   :  { %v1139_v1 = vsub.f32 %v105_v58, %v1138_v61  ;;  %v1144_v2 = vmul.f32 %v1143_v62, %v956_v10  ;;  %v1145_v3 = vmul.f32 %v1143_v62, %v959_v23  ;;  %v1146_v13 = vmul.f32 %v1143_v62, %v964_v15 }
 0x3e8   :  { %v1147_v49 = vmul.f32 %v1143_v62, %v967_v22 }
 0x3e9   :  { %v1151_v57 = vrot.slane %v1139_v1, %v2120_v9 }
 0x3eb   :  { %v1152_v60 = vadd.f32 %v1151_v57, %v1144_v2  ;;  %v1153_v0 = vadd.f32 %v1151_v57, %v1145_v3  ;;  %v1154_v4 = vadd.f32 %v1151_v57, %v1146_v13  ;;  %v1155_v7 = vadd.f32 %v1151_v57, %v1147_v49 }
 0x3ed   :  { %v1156_v14 = vadd.f32 %v1152_v60, %v1829_v28  ;;  %v1157_v17 = vadd.f32 %v1153_v0, %v1834_v29  ;;  %v1158_v20 = vadd.f32 %v1154_v4, %v1854_v37  ;;  %v1159_v27 = vadd.f32 %v1155_v7, %v1839_v30 }
 0x3ef   :  { %v1160_v5 = vmax.f32 %v1156_v14, 0.0  ;;  %v1161_v6 = vmax.f32 %v1157_v17, 0.0  ;;  %v1162_v10 = vmax.f32 %v1158_v20, 0.0  ;;  %v1163_v23 = vmax.f32 %v1159_v27, 0.0 }
 0x3f1   :  { %1164 = vst [vmem:[%s2218_s5] sm:$0xff] %v1160_v5  ;;  %1165 = vst [vmem:[%s2218_s5 + $0x8] sm:$0xff] %v1161_v6 }
 0x3f2   :  { %1166 = vst [vmem:[%s2218_s5 + $0x10] sm:$0xff] %v1162_v10  ;;  %1167 = vst [vmem:[%s2218_s5 + $0x18] sm:$0xff] %v1163_v23 }

</bundles_post_ra>
